<compile_context>
chip_gen: v7x
topology: tpu7x:2x2x1
jax: 0.10.0
libtpu: 0.0.40
codegen_flags: <defaults>
</compile_context>

<pallas_src>
import jax
import jax.numpy as jnp
from jax.experimental import pallas as pl
from jax.experimental.pallas import tpu as pltpu


# ----------------------------------------------------------------------------
# Fused path: whole image group resident per grid step.
# ----------------------------------------------------------------------------
def _se_fused_kernel(x_ref, w1t_ref, w2t_ref, o_ref):
    # x_ref: (Bt, C, HW)   w1t_ref: (C, Cr)   w2t_ref: (Cr, C)   o_ref: (Bt, C, HW)
    x = x_ref[...]
    hw = x.shape[-1]

    # AdaptiveAvgPool2d(1): mean over the spatial (lane) axis.
    y = (jnp.sum(x, axis=-1) * (1.0 / hw)).astype(jnp.float32)      # (Bt, C)

    # fc1 (no bias) + ReLU.
    z = jnp.dot(y, w1t_ref[...], preferred_element_type=jnp.float32)
    z = jnp.maximum(z, 0.0)                                         # (Bt, Cr)

    # fc2 (no bias) + Hsigmoid: relu6(x + 3) / 6
    s = jnp.dot(z, w2t_ref[...], preferred_element_type=jnp.float32)
    s = jnp.clip(s + 3.0, 0.0, 6.0) * (1.0 / 6.0)                   # (Bt, C)

    # Channel-wise rescale, broadcast over spatial lanes.
    o_ref[...] = (x * s[:, :, None]).astype(o_ref.dtype)


# ----------------------------------------------------------------------------
# Tiled fallback: pass 1 pools spatial tiles into per-channel sums,
# pass 2 rescales spatial tiles by the (tiny, JAX-computed) gate.
# ----------------------------------------------------------------------------
def _se_pool_kernel(x_ref, s_ref):
    # grid = (B, n_hw). x_ref: (1, C, HWt)   s_ref: (1, C, 1) resident across hw axis.
    t = pl.program_id(1)

    @pl.when(t == 0)
    def _():
        s_ref[...] = jnp.zeros_like(s_ref)

    s_ref[...] += jnp.sum(x_ref[...], axis=-1, keepdims=True)


def _se_scale_kernel(x_ref, g_ref, o_ref):
    # x_ref: (1, C, HWt)   g_ref: (1, C, 1)   o_ref: (1, C, HWt)
    o_ref[...] = (x_ref[...] * g_ref[...]).astype(o_ref.dtype)


# ----------------------------------------------------------------------------
# Block sizing helpers.
# ----------------------------------------------------------------------------
def _choose_block_batch(B, C, HW, itemsize, budget_bytes, min_steps=4):
    """Largest per-step batch Bt (divisor of B) whose double-buffered
    (input + output) blocks fit `budget_bytes`; prefer keeping >= min_steps
    grid steps (pipeline depth / megacore sharding) when the batch allows."""
    per_img = C * HW * itemsize
    divisors = [d for d in range(1, B + 1) if B % d == 0]
    # 2 pipeline buffers for x + 2 for out = 4 live copies of the block.
    fitting = [d for d in divisors if 4 * d * per_img <= budget_bytes]
    if not fitting:
        return 1
    deep = [d for d in fitting if B // d >= min_steps]
    return max(deep) if deep else max(fitting)


def _choose_hw_tile(C, HW, itemsize, budget_bytes):
    """Largest lane-aligned (multiple of 128) divisor of HW whose
    double-buffered in+out blocks fit the budget."""
    best = None
    for t in range(128, HW + 1, 128):
        if HW % t == 0 and 4 * C * t * itemsize <= budget_bytes:
            best = t
    if best is None:
        # TODO(synk): for HW with no lane-aligned divisor that fits, pad the
        # spatial axis (or tile C as well); fall back to the smallest aligned
        # divisor / full HW and rely on the raised vmem limit.
        cands = [t for t in range(128, HW + 1, 128) if HW % t == 0]
        best = min(cands) if cands else HW
    return best


def _vmem_budgets():
    """Generation-aware VMEM budget (v7x has 64 MiB physical vs 128 on v5e/v6e)."""
    try:
        vmem_cap = int(pltpu.get_tpu_info().vmem_capacity_bytes)
    except Exception:
        vmem_cap = 64 << 20  # conservative (v7x-sized) fallback
    block_budget = (3 * vmem_cap) // 8
    return vmem_cap, block_budget


def _vmem_limit_for(block_bytes, vmem_cap):
    return int(min(vmem_cap - (4 << 20), max(32 << 20, block_bytes + (8 << 20))))


# ----------------------------------------------------------------------------
# Wrapper.
# ----------------------------------------------------------------------------
def se_module2(x, w1, w2, *, force_spatial_tiling=False, hw_tile=None):
    """x: (B, C, H, W).  w1: (C//r, C+1) fc1 weight.  w2: (C, C//r) fc2 weight."""
    B, C, H, W = x.shape
    Cr = w1.shape[0]
    HW = H * W
    x_flat = x.reshape(B, C, HW)

    # TODO(synk): the reference forward is shape-inconsistent — fc1 is
    # Linear(channel+1, ...) but receives only `channel` pooled features; we
    # use the first C input columns of w1 (equivalent to appending a 0 feature).
    w1t = jnp.transpose(w1[:, :C]).astype(jnp.float32)   # (C, Cr)
    w2t = jnp.transpose(w2).astype(jnp.float32)          # (Cr, C)

    itemsize = jnp.dtype(x.dtype).itemsize
    vmem_cap, block_budget = _vmem_budgets()
    per_img = C * HW * itemsize

    if force_spatial_tiling or 4 * per_img > block_budget:
        out = _run_tiled(x_flat, w1t, w2t, block_budget, vmem_cap, hw_tile)
    else:
        out = _run_fused(x_flat, w1t, w2t, block_budget, vmem_cap)
    return out.reshape(B, C, H, W)


def _run_fused(x_flat, w1t, w2t, block_budget, vmem_cap):
    B, C, HW = x_flat.shape
    Cr = w1t.shape[1]
    itemsize = jnp.dtype(x_flat.dtype).itemsize

    bt = _choose_block_batch(B, C, HW, itemsize, block_budget)
    vmem_limit = _vmem_limit_for(4 * bt * C * HW * itemsize, vmem_cap)
    grid = (B // bt,)

    flops = 2 * B * C * HW + 4 * B * C * Cr
    bytes_accessed = 2 * B * C * HW * itemsize + (w1t.size + w2t.size) * 4

    return pl.pallas_call(
        _se_fused_kernel,
        out_shape=jax.ShapeDtypeStruct((B, C, HW), x_flat.dtype),
        grid_spec=pltpu.PrefetchScalarGridSpec(
            num_scalar_prefetch=0,
            grid=grid,
            in_specs=[
                pl.BlockSpec((bt, C, HW), lambda b: (b, 0, 0)),
                pl.BlockSpec((C, Cr), lambda b: (0, 0)),
                pl.BlockSpec((Cr, C), lambda b: (0, 0)),
            ],
            out_specs=pl.BlockSpec((bt, C, HW), lambda b: (b, 0, 0)),
        ),
        compiler_params=pltpu.CompilerParams(
            dimension_semantics=("parallel",),
            vmem_limit_bytes=vmem_limit),
        cost_estimate=pl.CostEstimate(
            flops=int(flops), transcendentals=0,
            bytes_accessed=int(bytes_accessed)),
        # Output has identical shape/dtype to x_flat: let XLA reuse the buffer.
        input_output_aliases={0: 0},
    )(x_flat, w1t, w2t)


def _run_tiled(x_flat, w1t, w2t, block_budget, vmem_cap, hw_tile=None):
    B, C, HW = x_flat.shape
    itemsize = jnp.dtype(x_flat.dtype).itemsize

    if hw_tile is None:
        hw_tile = _choose_hw_tile(C, HW, itemsize, block_budget)
    n_hw = HW // hw_tile
    vmem_limit = _vmem_limit_for(4 * C * hw_tile * itemsize, vmem_cap)

    # Pass 1: spatially-tiled pooling (reads x once, writes tiny per-channel sums).
    sums = pl.pallas_call(
        _se_pool_kernel,
        out_shape=jax.ShapeDtypeStruct((B, C, 1), jnp.float32),
        grid_spec=pltpu.PrefetchScalarGridSpec(
            num_scalar_prefetch=0,
            grid=(B, n_hw),
            in_specs=[pl.BlockSpec((1, C, hw_tile), lambda b, t: (b, 0, t))],
            out_specs=pl.BlockSpec((1, C, 1), lambda b, t: (b, 0, 0)),
        ),
        compiler_params=pltpu.CompilerParams(
            dimension_semantics=("parallel", "arbitrary"),
            vmem_limit_bytes=vmem_limit),
        cost_estimate=pl.CostEstimate(
            flops=int(B * C * HW), transcendentals=0,
            bytes_accessed=int(B * C * HW * itemsize + B * C * 4)),
    )(x_flat)

    # Gate MLP: (B, C) -> (B, Cr) -> (B, C).  A few hundred FLOPs; computed in
    # plain JAX to keep the heavy-data kernels trivially layout-friendly.
    y = sums[..., 0] * (1.0 / HW)
    z = jnp.maximum(jnp.dot(y, w1t, preferred_element_type=jnp.float32), 0.0)
    s = jnp.dot(z, w2t, preferred_element_type=jnp.float32)
    gate = (jnp.clip(s + 3.0, 0.0, 6.0) * (1.0 / 6.0))[..., None]   # (B, C, 1)

    # Pass 2: spatially-tiled per-channel rescale (reads x + gate, writes out).
    return pl.pallas_call(
        _se_scale_kernel,
        out_shape=jax.ShapeDtypeStruct((B, C, HW), x_flat.dtype),
        grid_spec=pltpu.PrefetchScalarGridSpec(
            num_scalar_prefetch=0,
            grid=(B, n_hw),
            in_specs=[
                pl.BlockSpec((1, C, hw_tile), lambda b, t: (b, 0, t)),
                pl.BlockSpec((1, C, 1), lambda b, t: (b, 0, 0)),
            ],
            out_specs=pl.BlockSpec((1, C, hw_tile), lambda b, t: (b, 0, t)),
        ),
        compiler_params=pltpu.CompilerParams(
            dimension_semantics=("parallel", "parallel"),
            vmem_limit_bytes=vmem_limit),
        cost_estimate=pl.CostEstimate(
            flops=int(B * C * HW), transcendentals=0,
            bytes_accessed=int(2 * B * C * HW * itemsize + B * C * 4)),
        input_output_aliases={0: 0},
    )(x_flat, gate)


# ----------------------------------------------------------------------------
# Pure-JAX reference with identical semantics.
# ----------------------------------------------------------------------------
def se_module2_ref(x, w1, w2):
    B, C, H, W = x.shape
    y = jnp.mean(x, axis=(2, 3))                                 # (B, C)
    z = jnp.maximum(y @ w1[:, :C].T, 0.0)                        # (B, Cr)
    s = jnp.clip(z @ w2.T + 3.0, 0.0, 6.0) / 6.0                 # (B, C)
    return x * s[:, :, None, None]


if __name__ == "__main__":
    B, C, H, W = 2, 8, 16, 16
    reduction = 4
    Cr = C // reduction

    key = jax.random.PRNGKey(0)
    kx, k1, k2 = jax.random.split(key, 3)

    x = jax.random.normal(kx, (B, C, H, W), dtype=jnp.float32)
    # Deterministic "Linear" weights (PyTorch shapes: (out_features, in_features)).
    w1 = (jax.random.uniform(k1, (Cr, C + 1), dtype=jnp.float32,
                             minval=-1.0, maxval=1.0) / jnp.sqrt(C + 1.0))
    w2 = (jax.random.uniform(k2, (C, Cr), dtype=jnp.float32,
                             minval=-1.0, maxval=1.0) / jnp.sqrt(float(Cr)))

    ref = jax.block_until_ready(se_module2_ref(x, w1, w2))

    # Fused (default) path.
    out_fused = jax.block_until_ready(se_module2(x, w1, w2))
    assert out_fused.shape == (B, C, H, W)
    assert jnp.allclose(out_fused, ref, atol=1e-5, rtol=1e-5), "fused path mismatch"

    # Spatially-tiled fallback path (forced, with 2 spatial tiles so the
    # cross-tile accumulation is exercised).
    out_tiled = jax.block_until_ready(
        se_module2(x, w1, w2, force_spatial_tiling=True, hw_tile=128))
    assert jnp.allclose(out_tiled, ref, atol=1e-5, rtol=1e-5), "tiled path mismatch"

    print("KERNEL_OK")
</pallas_src>

<mosaic_0001>
module attributes {stable_mosaic.version = 11 : i64} {
  func.func @_se_fused_kernel(%arg0: i32, %arg1: memref<2x8x256xf32, #tpu.memory_space<vmem>>, %arg2: memref<8x2xf32, #tpu.memory_space<vmem>>, %arg3: memref<2x8xf32, #tpu.memory_space<vmem>>, %arg4: memref<2x8x256xf32, #tpu.memory_space<vmem>>) attributes {dimension_semantics = [#tpu.dimension_semantics<parallel>], iteration_bounds = array<i64: 1>, scalar_prefetch = 0 : i64, scratch_operands = 0 : i64, tpu.core_type = #tpu.core_type<tc>, window_params = [{transform_indices = @transform_0, window_bounds = array<i64: 2, 8, 256>}, {pipeline_mode = #tpu.pipeline_mode<synchronous>, transform_indices = @transform_1, window_bounds = array<i64: 8, 2>}, {pipeline_mode = #tpu.pipeline_mode<synchronous>, transform_indices = @transform_2, window_bounds = array<i64: 2, 8>}, {transform_indices = @transform_3, window_bounds = array<i64: 2, 8, 256>}]} {
    %c0 = arith.constant 0 : index
    %c0_0 = arith.constant 0 : index
    %c0_1 = arith.constant 0 : index
    %0 = vector.load %arg1[%c0, %c0_0, %c0_1] : memref<2x8x256xf32, #tpu.memory_space<vmem>>, vector<2x8x256xf32>
    %cst = arith.constant dense<0.000000e+00> : vector<2x8xf32>
    %1 = vector.multi_reduction <add>, %0, %cst [2] : vector<2x8x256xf32> to vector<2x8xf32>
    %cst_2 = arith.constant 3.906250e-03 : f32
    %2 = vector.broadcast %cst_2 : f32 to vector<2x8xf32>
    %3 = arith.mulf %1, %2 : vector<2x8xf32>
    %c0_3 = arith.constant 0 : index
    %c0_4 = arith.constant 0 : index
    %4 = vector.load %arg2[%c0_3, %c0_4] : memref<8x2xf32, #tpu.memory_space<vmem>>, vector<8x2xf32>
    %cst_5 = arith.constant dense<0.000000e+00> : vector<2x2xf32>
    %5 = tpu.matmul %3, %4, %cst_5 {dimension_numbers = #tpu.dot_dimension_numbers<[1], [0], [0], [1], [0, 0, 1, 1], [], []>} : vector<2x8xf32>, vector<8x2xf32>, vector<2x2xf32> -> vector<2x2xf32>
    %cst_6 = arith.constant 0.000000e+00 : f32
    %6 = vector.broadcast %cst_6 : f32 to vector<2x2xf32>
    %7 = arith.maximumf %5, %6 : vector<2x2xf32>
    %c0_7 = arith.constant 0 : index
    %c0_8 = arith.constant 0 : index
    %8 = vector.load %arg3[%c0_7, %c0_8] : memref<2x8xf32, #tpu.memory_space<vmem>>, vector<2x8xf32>
    %cst_9 = arith.constant dense<0.000000e+00> : vector<2x8xf32>
    %9 = tpu.matmul %7, %8, %cst_9 {dimension_numbers = #tpu.dot_dimension_numbers<[1], [0], [0], [1], [0, 0, 1, 1], [], []>} : vector<2x2xf32>, vector<2x8xf32>, vector<2x8xf32> -> vector<2x8xf32>
    %cst_10 = arith.constant 3.000000e+00 : f32
    %10 = vector.broadcast %cst_10 : f32 to vector<2x8xf32>
    %11 = arith.addf %9, %10 : vector<2x8xf32>
    %cst_11 = arith.constant 0.000000e+00 : f32
    %cst_12 = arith.constant 6.000000e+00 : f32
    %12 = vector.broadcast %cst_11 : f32 to vector<2x8xf32>
    %13 = arith.maximumf %12, %11 : vector<2x8xf32>
    %14 = vector.broadcast %cst_12 : f32 to vector<2x8xf32>
    %15 = arith.minimumf %14, %13 : vector<2x8xf32>
    %cst_13 = arith.constant 0.166666672 : f32
    %16 = vector.broadcast %cst_13 : f32 to vector<2x8xf32>
    %17 = arith.mulf %15, %16 : vector<2x8xf32>
    %18 = vector.shape_cast %17 : vector<2x8xf32> to vector<2x8x1xf32>
    %19 = vector.broadcast %18 : vector<2x8x1xf32> to vector<2x8x256xf32>
    %20 = arith.mulf %0, %19 : vector<2x8x256xf32>
    %c0_14 = arith.constant 0 : index
    %c0_15 = arith.constant 0 : index
    %c0_16 = arith.constant 0 : index
    %21 = vector.load %arg4[%c0_14, %c0_15, %c0_16] : memref<2x8x256xf32, #tpu.memory_space<vmem>>, vector<2x8x256xf32>
    tpu.vector_store %arg4[%c0_14, %c0_15, %c0_16], %20 {strides = array<i32>} : memref<2x8x256xf32, #tpu.memory_space<vmem>>, vector<2x8x256xf32>,
    return
  }
  func.func @transform_0(%arg0: i32) -> (i32, i32, i32) {
    %c0_i32 = arith.constant 0 : i32
    %c0_i32_0 = arith.constant 0 : i32
    %c0_i32_1 = arith.constant 0 : i32
    return %arg0, %c0_i32, %c0_i32_0 : i32, i32, i32
  }
  func.func @transform_1(%arg0: i32) -> (i32, i32) {
    %c0_i32 = arith.constant 0 : i32
    %c0_i32_0 = arith.constant 0 : i32
    %c0_i32_1 = arith.constant 0 : i32
    return %c0_i32, %c0_i32_0 : i32, i32
  }
  func.func @transform_2(%arg0: i32) -> (i32, i32) {
    %c0_i32 = arith.constant 0 : i32
    %c0_i32_0 = arith.constant 0 : i32
    %c0_i32_1 = arith.constant 0 : i32
    return %c0_i32, %c0_i32_0 : i32, i32
  }
  func.func @transform_3(%arg0: i32) -> (i32, i32, i32) {
    %c0_i32 = arith.constant 0 : i32
    %c0_i32_0 = arith.constant 0 : i32
    %c0_i32_1 = arith.constant 0 : i32
    return %arg0, %c0_i32, %c0_i32_0 : i32, i32, i32
  }
}

</mosaic_0001>

<bundles_post_ra>
// kernel: tpu_custom_call.1
= control target key start
LH: loop header
LB: loop body
LE: loop exit
PB: predicated region body
PF: predicated region fallthrough
CT: control target
= control target key end

     0   :  { %8 = vsyncpa [#allocation3], 0  ;;  %s384_s0 = inlined_call_operand.hbm [shape: f32[2,8,256], index: 0, kind: input, shape index: {}, may-alias: {0,3}]   ;;  %s385_s1 = inlined_call_operand.vmem [shape: f32[8,2], index: 1, kind: input, shape index: {}]   ;;  %s386_s2 = inlined_call_operand.vmem [shape: f32[2,8], index: 2, kind: input, shape index: {}]   ;;  %s387_s3 = inlined_call_operand.hbm [shape: f32[2,8,256], index: 3, kind: output, shape index: {}, may-alias: {0,3}]  }
   0x1   :  { %9 = vsyncpa [#allocation4], 0  ;;  %s322_s12 = smov [#allocation2]   ;;  %s274_s16 = scalar_lea.hbm %s384_s0, 512 }
   0x2   :  { %s15_s13 = sshll.u32 %s322_s12, 4  ;;  %p275_p0 = scmp.ne.s32.totalorder %s384_s0, %s274_s16  ;;  %s16_s13 = int_to_ptr.vmem [resolvable:$true] %s15_s13 }
   0x3   :  { %p278_p1 = scmp.lt.u32.totalorder %s274_s16, %s384_s0 }
   0x5   :  { %p280_p2 = pnand %p278_p1, %p275_p0 }
   0x7   :  { %283 = shalt.err (!%p280_p2)
}
   0x8   :  { %s284_s21 = scalar_lea.vmem %s16_s13, 512  ;;  %p289_p4 = scmp.lt.s32.totalorder %s16_s13, %s16_s13 }
   0x9   :  { %p285_p3 = scmp.ne.s32.totalorder %s16_s13, %s284_s21  ;;  %p290_p5 = scmp.lt.s32.totalorder %s284_s21, %s284_s21 }
   0xb   :  { %p291_p6 = por %p290_p5, %p289_p4 }
   0xd   :  { %p292_p7 = pnand %p291_p6, %p285_p3 }
   0xf   :  { %295 = shalt.err (!%p292_p7)
}
  0x10   :  { %s323_s22 = smov 256   ;;  %s324_s23 = smov 16  }
  0x11   :  { %21 = dma.hbm_to_vmem [thread:$0]  %s384_s0, 512, %s16_s13, [#allocation3], %s323_s22, %s323_s22, %s324_s23  }
  0x12   :  { %318 = dma.done.wait [#allocation3], 512  }
  0x13   :  { %319 = vsyncadd [#allocation3], 4294966784  ;;  %v29_v0 = vld [vmem:[#allocation2] sm:$0xff]  ;;  %v30_v1 = vld [vmem:[#allocation2 + $0x8] sm:$0xff]  ;;  %v325_v7 = vmov 0.0   ;;  %vm326_vm0 = vmmov 0   ;;  %v44_v8 = vlaneseq }
  0x14   :  { %v31_v2 = vld [vmem:[#allocation2 + $0x10] sm:$0xff]  ;;  %v33_v3 = vadd.f32 %v30_v1, %v29_v0  ;;  %v32_v4 = vld [vmem:[#allocation2 + $0x18] sm:$0xff]  ;;  %v41_v6 = vld [vmem:[%s385_s1] sm:$0xff]  ;;  %258 = vmatprep.subr.mxu0 %v325_v7  ;;  %260 = vmatprep.mubr.msk.f32.mxu0 %vm326_vm0, %v325_v7  ;;  %vm54_vm1 = vcmask 1041409   ;;  %vm56_vm2 = vcmask 64512   ;;  %vm135_vm3 = vcmask 1041408  }
  0x15   :  { %v36_v5 = vadd.f32 %v32_v4, %v31_v2  ;;  %259 = vmatpush3.msra.mxu0 %v41_v6  ;;  %263 = vmatprep.subr.mxu1 %v325_v7  ;;  %v45_v9 = vand.u32 127, %v44_v8  ;;  %v47_v10 = vshrl.u32 %v44_v8, 7  ;;  %v130_v19 = vld [vmem:[%s386_s2] sm:$0x3]  ;;  %vm131_vm4 = vcmask 15360   ;;  %s327_s2 = smov [#allocation5]  }
  0x16   :  { %34 = vadd.xlane.f32.xlu0 %v33_v3  ;;  %265 = vmatprep.mubr.msk.f32.mxu1 %vm326_vm0, %v325_v7  ;;  %s239_s28 = sshll.u32 %s327_s2, 4  ;;  %s240_s28 = int_to_ptr.vmem [resolvable:$true] %s239_s28 }
  0x17   :  { %v48_v12 = vsub.s32 %v45_v9, %v47_v10  ;;  %264 = vmatpush3.msk.msra.mxu1 %vm135_vm3, %v130_v19  ;;  %v214_v28 = vsub.s32 0, %v47_v10  ;;  %v221_v31 = vsub.s32 1, %v47_v10  ;;  %s296_s29 = scalar_lea.vmem %s240_s28, 512  ;;  %p301_p9 = scmp.lt.s32.totalorder %s240_s28, %s240_s28 }
  0x18   :  { %p297_p8 = scmp.ne.s32.totalorder %s240_s28, %s296_s29  ;;  %p302_p10 = scmp.lt.s32.totalorder %s296_s29, %s296_s29 }
  0x1a   :  { %37 = vadd.xlane.f32.xlu0 %v36_v5  ;;  %p303_p11 = por %p302_p10, %p301_p9 }
  0x1c   :  { %p304_p12 = pnand %p303_p11, %p297_p8 }
  0xa3   :  { %v35_v11 = vpop.xlane.xlu0 %34 }
  0xa4   :  { %v39_v13 = vmul.f32 0.00390625, %v35_v11 }
  0xa6   :  { %v49_v16 = vrot.slane %v39_v13, %v48_v12 }
  0xa7   :  { %v38_v14 = vpop.xlane.xlu0 %37 }
  0xa8   :  { %v40_v15 = vmul.f32 0.00390625, %v38_v14 }
  0xaa   :  { %v53_v17 = vrot.slane %v40_v15, %v48_v12 }
  0xac   :  { %v55_v18 = vsel %vm54_vm1, %v53_v17, %v49_v16 }
  0xad   :  { %261 = vmatmul.mubr.msk.f32.vlgmr.msra.gmra.mrb[0].mxu0 %vm56_vm2, %v55_v18 }
 0x180   :  { %v125_v20 = vpop.f32.mrb[0].mxu0 }
 0x181   :  { %v129_v21 = vmax.f32 %v125_v20, 0.0  ;;  %v262_v22 = vpop.f32.mrb[1].mxu0 }
 0x183   :  { %266 = vmatmul.mubr.msk.f32.vlgmr.msra.gmra.mrb[0].mxu1 %vm131_vm4, %v129_v21 }
 0x256   :  { %v205_v23 = vpop.f32.mrb[0].mxu1 }
 0x257   :  { %v206_v24 = vadd.f32 3.0, %v205_v23  ;;  %v267_v25 = vpop.f32.mrb[1].mxu1 }
 0x259   :  { %v209_v26 = vmax.f32 %v206_v24, 0.0 }
 0x25b   :  { %v210_v27 = vmin.f32 %v209_v26, 6.0 }
 0x25d   :  { %v211_v29 = vmul.f32 0.16666667, %v210_v27 }
 0x25f   :  { %v215_v30 = vrot.slane %v211_v29, %v214_v28  ;;  %v222_v32 = vrot.slane %v211_v29, %v221_v31 }
 0x261   :  { %217 = vbcast.lane.b32.xlu1 %v215_v30, 256 }
 0x265   :  { %224 = vbcast.lane.b32.xlu1 %v222_v32, 256 }
 0x2d3   :  { %v218_v33 = vpop.permute.xlu1 %217 }
 0x2d4   :  { %v226_v34 = vmul.f32 %v218_v33, %v29_v0  ;;  %v227_v35 = vmul.f32 %v218_v33, %v30_v1 }
 0x2d6   :  { %230 = vst [vmem:[#allocation5] sm:$0xff] %v226_v34  ;;  %231 = vst [vmem:[#allocation5 + $0x8] sm:$0xff] %v227_v35 }
 0x2d7   :  { %v225_v36 = vpop.permute.xlu1 %224 }
 0x2d8   :  { %v228_v37 = vmul.f32 %v225_v36, %v31_v2  ;;  %v229_v38 = vmul.f32 %v225_v36, %v32_v4 }
 0x2da   :  { %232 = vst [vmem:[#allocation5 + $0x10] sm:$0xff] %v228_v37  ;;  %233 = vst [vmem:[#allocation5 + $0x18] sm:$0xff] %v229_v38 }
 0x2db   :  { %307 = shalt.err (!%p304_p12)
}
 0x2dc   :  { %s308_s5 = scalar_lea.hbm %s387_s3, 512 }
 0x2dd   :  { %p309_p13 = scmp.ne.s32.totalorder %s387_s3, %s308_s5  ;;  %p312_p0 = scmp.lt.u32.totalorder %s308_s5, %s387_s3 }
 0x2df   :  { %p314_p1 = pnand %p312_p0, %p309_p13 }
 0x2e1   :  { %317 = shalt.err (!%p314_p1)
}
 0x2e2   :  { %245 = dma.vmem_to_hbm [thread:$0]  %s240_s28, 512, %s387_s3, [#allocation4], %s323_s22, %s323_s22, %s324_s23  }
 0x2e3   :  { %320 = dma.done.wait [#allocation4], 512  }
 0x2e4   :  { %321 = vsyncadd [#allocation4], 4294966784 }
 0x2e5   :  { %249 = vsyncpa [#allocation3], 1 }
 0x2e6   :  { %250 = vsyncpa [#allocation4], 1 }

</bundles_post_ra>
